<compile_context>
chip_gen: v5e
topology: v5e:2x2
jax: 0.10.0
libtpu: 0.0.40
codegen_flags: <defaults>
</compile_context>

<pallas_src>
import functools

import jax
import jax.numpy as jnp
from jax import lax
from jax.experimental import pallas as pl
from jax.experimental.pallas import tpu as pltpu


def _asp_kernel(x_ref, w1_ref, b1_ref, w2_ref, b2_ref, out_ref,
                m_scr, l_scr, s1_scr, s2_scr,
                *, T, tT, needs_mask, matmul_dtype):
    t_idx = pl.program_id(1)

    # ---- init running stats at the first time tile of this batch element ----
    @pl.when(t_idx == 0)
    def _init():
        m_scr[...] = jnp.full_like(m_scr, -jnp.inf)
        l_scr[...] = jnp.zeros_like(l_scr)
        s1_scr[...] = jnp.zeros_like(s1_scr)
        s2_scr[...] = jnp.zeros_like(s2_scr)

    x = x_ref[0]                                            # (C, tT) f32
    if needs_mask:
        col = lax.broadcasted_iota(jnp.int32, (1, tT), 1)
        valid = (t_idx * tT + col) < T                      # (1, tT)
        x = jnp.where(valid, x, 0.0)

    # linear1 (Conv1d k=1): (Bn, C) @ (C, tT) + b1 -> tanh      [MXU, bf16]
    xb = x.astype(matmul_dtype)
    h = jnp.tanh(
        jnp.dot(w1_ref[...], xb, preferred_element_type=jnp.float32)
        + b1_ref[...])                                      # (Bn, tT) f32

    # linear2 (Conv1d k=1): (C, Bn) @ (Bn, tT) + b2             [MXU, bf16]
    a = (jnp.dot(w2_ref[...], h.astype(matmul_dtype),
                 preferred_element_type=jnp.float32)
         + b2_ref[...])                                     # (C, tT) f32
    if needs_mask:
        a = jnp.where(valid, a, -jnp.inf)

    # ---- online softmax over time (lane axis) + running attentive stats ----
    m_prev = m_scr[...]                                     # (C, 1)
    m_new = jnp.maximum(m_prev, jnp.max(a, axis=-1, keepdims=True))
    corr = jnp.exp(m_prev - m_new)                          # (C, 1)
    e = jnp.exp(a - m_new)                                  # (C, tT)
    ex = e * x                                              # reused for 2nd moment
    l_scr[...] = corr * l_scr[...] + jnp.sum(e, axis=-1, keepdims=True)
    s1_scr[...] = corr * s1_scr[...] + jnp.sum(ex, axis=-1, keepdims=True)
    s2_scr[...] = corr * s2_scr[...] + jnp.sum(ex * x, axis=-1, keepdims=True)
    m_scr[...] = m_new

    # ---- finalize on the last time tile ----
    @pl.when(t_idx == pl.num_programs(1) - 1)
    def _finalize():
        inv_l = pl.reciprocal(l_scr[...], approx=False)     # (C, 1)
        mean = s1_scr[...] * inv_l
        sq = s2_scr[...] * inv_l
        std = jnp.sqrt(jnp.maximum(sq - mean * mean, 1e-9))
        out_ref[0, :, 0:1] = mean
        out_ref[0, :, 1:2] = std


def attentive_stats_pool(x_nct, w1, b1, w2, b2, *, time_tile=512,
                         matmul_dtype=jnp.bfloat16,
                         vmem_limit_bytes=48 * 1024 * 1024):
    """Forward of AttentiveStatsPool.

    x_nct: (B, C, T) float32 (native PyTorch NCT layout, consumed as-is)
    w1:    (Bn, C) = linear1.weight[:, :, 0],  b1: (Bn,)
    w2:    (C, Bn) = linear2.weight[:, :, 0],  b2: (C,)
    returns (B, 2*C) = concat([mean, std], dim=1)
    """
    B, C, T = x_nct.shape
    Bn = w1.shape[0]

    x_nct = jnp.asarray(x_nct, jnp.float32)                 # no layout change
    w1_m = jnp.asarray(w1, matmul_dtype)                    # (Bn, C)
    w2_m = jnp.asarray(w2, matmul_dtype)                    # (C, Bn)
    b1_2d = jnp.asarray(b1, jnp.float32).reshape(Bn, 1)
    b2_2d = jnp.asarray(b2, jnp.float32).reshape(C, 1)

    # Time tile: full T if small, else a multiple of 128 (lane width).
    if T <= time_tile:
        tT = T
    else:
        tT = max(128, (time_tile // 128) * 128)
    nT = pl.cdiv(T, tT)
    needs_mask = (T % tT) != 0

    kernel = functools.partial(_asp_kernel, T=T, tT=tT, needs_mask=needs_mask,
                               matmul_dtype=matmul_dtype)

    out = pl.pallas_call(
        kernel,
        out_shape=jax.ShapeDtypeStruct((B, C, 2), jnp.float32),
        grid_spec=pltpu.PrefetchScalarGridSpec(
            num_scalar_prefetch=0,
            grid=(B, nT),                                   # reduction axis last
            in_specs=[
                pl.BlockSpec((1, C, tT), lambda b, t: (b, 0, t)),
                pl.BlockSpec((Bn, C), lambda b, t: (0, 0)),
                pl.BlockSpec((Bn, 1), lambda b, t: (0, 0)),
                pl.BlockSpec((C, Bn), lambda b, t: (0, 0)),
                pl.BlockSpec((C, 1), lambda b, t: (0, 0)),
            ],
            out_specs=pl.BlockSpec((1, C, 2), lambda b, t: (b, 0, 0)),
            scratch_shapes=[pltpu.VMEM((C, 1), jnp.float32)] * 4,
        ),
        compiler_params=pltpu.CompilerParams(
            dimension_semantics=("parallel", "arbitrary"),
            vmem_limit_bytes=vmem_limit_bytes,
        ),
    )(x_nct, w1_m, b1_2d, w2_m, b2_2d)

    # Tiny glue: (B, C, 2) -> (B, 2C) == concat([mean, std], dim=1).
    return jnp.concatenate([out[:, :, 0], out[:, :, 1]], axis=1)


def _reference(x_nct, w1, b1, w2, b2):
    # pure-JAX reference mirroring the PyTorch forward (f32 throughout)
    h = jnp.tanh(jnp.einsum("bct,oc->bot", x_nct, w1) + b1[None, :, None])
    a = jnp.einsum("bot,co->bct", h, w2) + b2[None, :, None]
    alpha = jax.nn.softmax(a, axis=2)
    mean = jnp.sum(alpha * x_nct, axis=2)
    resid = jnp.sum(alpha * x_nct**2, axis=2) - mean**2
    std = jnp.sqrt(jnp.maximum(resid, 1e-9))
    return jnp.concatenate([mean, std], axis=1)


if __name__ == "__main__":
    key = jax.random.PRNGKey(0)

    def run_case(B, C, T, Bn, tol):
        k = jax.random.fold_in(key, B * 100000 + C * 1000 + T * 10 + Bn)
        kx, k1, k2, k3, k4 = jax.random.split(k, 5)
        x = jax.random.normal(kx, (B, C, T), dtype=jnp.float32)
        # Conv1d k=1 weights squeezed to 2D
        w1 = jax.random.normal(k1, (Bn, C), dtype=jnp.float32) * 0.1
        b1 = jax.random.normal(k2, (Bn,), dtype=jnp.float32) * 0.1
        w2 = jax.random.normal(k3, (C, Bn), dtype=jnp.float32) * 0.1
        b2 = jax.random.normal(k4, (C,), dtype=jnp.float32) * 0.1

        out = attentive_stats_pool(x, w1, b1, w2, b2, time_tile=128)
        out = jax.block_until_ready(out)

        ref = _reference(x, w1, b1, w2, b2)
        assert out.shape == (B, 2 * C), out.shape
        # bf16 matmul operands (f32 accumulation + f32 stats) -> loose tolerance
        assert jnp.allclose(out, ref, atol=tol, rtol=tol), (
            float(jnp.max(jnp.abs(out - ref))))

    # tiny case: single time tile, blocks == full array dims
    run_case(B=2, C=16, T=8, Bn=8, tol=3e-2)
    # tiled case: online softmax across 2 time tiles + masked partial last tile
    run_case(B=2, C=128, T=200, Bn=16, tol=3e-2)

    print("KERNEL_OK")
</pallas_src>

<mosaic_0001>
module attributes {stable_mosaic.version = 11 : i64} {
  func.func @_asp_kernel(%arg0: i32, %arg1: i32, %arg2: memref<1x16x8xf32, #tpu.memory_space<vmem>>, %arg3: memref<8x16xbf16, #tpu.memory_space<vmem>>, %arg4: memref<8x1xf32, #tpu.memory_space<vmem>>, %arg5: memref<16x8xbf16, #tpu.memory_space<vmem>>, %arg6: memref<16x1xf32, #tpu.memory_space<vmem>>, %arg7: memref<1x16x2xf32, #tpu.memory_space<vmem>>, %arg8: memref<16x1xf32, #tpu.memory_space<vmem>>, %arg9: memref<16x1xf32, #tpu.memory_space<vmem>>, %arg10: memref<16x1xf32, #tpu.memory_space<vmem>>, %arg11: memref<16x1xf32, #tpu.memory_space<vmem>>) attributes {dimension_semantics = [#tpu.dimension_semantics<parallel>, #tpu.dimension_semantics<arbitrary>], iteration_bounds = array<i64: 2, 1>, scalar_prefetch = 0 : i64, scratch_operands = 4 : i64, tpu.core_type = #tpu.core_type<tc>, window_params = [{transform_indices = @transform_0, window_bounds = array<i64: 1, 16, 8>}, {pipeline_mode = #tpu.pipeline_mode<synchronous>, transform_indices = @transform_1, window_bounds = array<i64: 8, 16>}, {pipeline_mode = #tpu.pipeline_mode<synchronous>, transform_indices = @transform_2, window_bounds = array<i64: 8, 1>}, {pipeline_mode = #tpu.pipeline_mode<synchronous>, transform_indices = @transform_3, window_bounds = array<i64: 16, 8>}, {pipeline_mode = #tpu.pipeline_mode<synchronous>, transform_indices = @transform_4, window_bounds = array<i64: 16, 1>}, {transform_indices = @transform_5, window_bounds = array<i64: 1, 16, 2>}]} {
    %c0_i32 = arith.constant 0 : i32
    %0 = arith.cmpi eq, %arg1, %c0_i32 : i32
    %1 = arith.extui %0 : i1 to i32
    %c0_i32_0 = arith.constant 0 : i32
    %2 = arith.cmpi ne, %1, %c0_i32_0 : i32
    scf.if %2 {
      %cst_34 = arith.constant 0xFF800000 : f32
      %51 = vector.broadcast %cst_34 : f32 to vector<16x1xf32>
      %c0_35 = arith.constant 0 : index
      %c0_36 = arith.constant 0 : index
      %52 = vector.load %arg8[%c0_35, %c0_36] : memref<16x1xf32, #tpu.memory_space<vmem>>, vector<16x1xf32>
      tpu.vector_store %arg8[%c0_35, %c0_36], %51 {strides = array<i32>} : memref<16x1xf32, #tpu.memory_space<vmem>>, vector<16x1xf32>,
      %cst_37 = arith.constant 0.000000e+00 : f32
      %53 = vector.broadcast %cst_37 : f32 to vector<16x1xf32>
      %c0_38 = arith.constant 0 : index
      %c0_39 = arith.constant 0 : index
      %54 = vector.load %arg9[%c0_38, %c0_39] : memref<16x1xf32, #tpu.memory_space<vmem>>, vector<16x1xf32>
      tpu.vector_store %arg9[%c0_38, %c0_39], %53 {strides = array<i32>} : memref<16x1xf32, #tpu.memory_space<vmem>>, vector<16x1xf32>,
      %cst_40 = arith.constant 0.000000e+00 : f32
      %55 = vector.broadcast %cst_40 : f32 to vector<16x1xf32>
      %c0_41 = arith.constant 0 : index
      %c0_42 = arith.constant 0 : index
      %56 = vector.load %arg10[%c0_41, %c0_42] : memref<16x1xf32, #tpu.memory_space<vmem>>, vector<16x1xf32>
      tpu.vector_store %arg10[%c0_41, %c0_42], %55 {strides = array<i32>} : memref<16x1xf32, #tpu.memory_space<vmem>>, vector<16x1xf32>,
      %cst_43 = arith.constant 0.000000e+00 : f32
      %57 = vector.broadcast %cst_43 : f32 to vector<16x1xf32>
      %c0_44 = arith.constant 0 : index
      %c0_45 = arith.constant 0 : index
      %58 = vector.load %arg11[%c0_44, %c0_45] : memref<16x1xf32, #tpu.memory_space<vmem>>, vector<16x1xf32>
      tpu.vector_store %arg11[%c0_44, %c0_45], %57 {strides = array<i32>} : memref<16x1xf32, #tpu.memory_space<vmem>>, vector<16x1xf32>,
    } else {
    }
    %c0 = arith.constant 0 : index
    %c0_1 = arith.constant 0 : index
    %c0_2 = arith.constant 0 : index
    %3 = vector.load %arg2[%c0, %c0_1, %c0_2] : memref<1x16x8xf32, #tpu.memory_space<vmem>>, vector<1x16x8xf32>
    %4 = vector.shape_cast %3 : vector<1x16x8xf32> to vector<16x8xf32>
    %5 = arith.truncf %4 : vector<16x8xf32> to vector<16x8xbf16>
    %c0_3 = arith.constant 0 : index
    %c0_4 = arith.constant 0 : index
    %6 = vector.load %arg3[%c0_3, %c0_4] : memref<8x16xbf16, #tpu.memory_space<vmem>>, vector<8x16xbf16>
    %cst = arith.constant dense<0.000000e+00> : vector<8x8xf32>
    %7 = tpu.matmul %6, %5, %cst {dimension_numbers = #tpu.dot_dimension_numbers<[1], [0], [0], [1], [0, 0, 1, 1], [], []>} : vector<8x16xbf16>, vector<16x8xbf16>, vector<8x8xf32> -> vector<8x8xf32>
    %c0_5 = arith.constant 0 : index
    %c0_6 = arith.constant 0 : index
    %8 = vector.load %arg4[%c0_5, %c0_6] : memref<8x1xf32, #tpu.memory_space<vmem>>, vector<8x1xf32>
    %9 = vector.broadcast %8 : vector<8x1xf32> to vector<8x8xf32>
    %10 = arith.addf %7, %9 : vector<8x8xf32>
    %11 = math.tanh %10 : vector<8x8xf32>
    %c0_7 = arith.constant 0 : index
    %c0_8 = arith.constant 0 : index
    %12 = vector.load %arg5[%c0_7, %c0_8] : memref<16x8xbf16, #tpu.memory_space<vmem>>, vector<16x8xbf16>
    %13 = arith.truncf %11 : vector<8x8xf32> to vector<8x8xbf16>
    %cst_9 = arith.constant dense<0.000000e+00> : vector<16x8xf32>
    %14 = tpu.matmul %12, %13, %cst_9 {dimension_numbers = #tpu.dot_dimension_numbers<[1], [0], [0], [1], [0, 0, 1, 1], [], []>} : vector<16x8xbf16>, vector<8x8xbf16>, vector<16x8xf32> -> vector<16x8xf32>
    %c0_10 = arith.constant 0 : index
    %c0_11 = arith.constant 0 : index
    %15 = vector.load %arg6[%c0_10, %c0_11] : memref<16x1xf32, #tpu.memory_space<vmem>>, vector<16x1xf32>
    %16 = vector.broadcast %15 : vector<16x1xf32> to vector<16x8xf32>
    %17 = arith.addf %14, %16 : vector<16x8xf32>
    %c0_12 = arith.constant 0 : index
    %c0_13 = arith.constant 0 : index
    %18 = vector.load %arg8[%c0_12, %c0_13] : memref<16x1xf32, #tpu.memory_space<vmem>>, vector<16x1xf32>
    %cst_14 = arith.constant dense<0xFF800000> : vector<16xf32>
    %19 = vector.multi_reduction <maximumf>, %17, %cst_14 [1] : vector<16x8xf32> to vector<16xf32>
    %20 = vector.shape_cast %19 : vector<16xf32> to vector<16x1xf32>
    %21 = arith.maximumf %18, %20 : vector<16x1xf32>
    %22 = arith.subf %18, %21 : vector<16x1xf32>
    %23 = math.exp %22 : vector<16x1xf32>
    %24 = vector.broadcast %21 : vector<16x1xf32> to vector<16x8xf32>
    %25 = arith.subf %17, %24 : vector<16x8xf32>
    %26 = math.exp %25 : vector<16x8xf32>
    %27 = arith.mulf %26, %4 : vector<16x8xf32>
    %c0_15 = arith.constant 0 : index
    %c0_16 = arith.constant 0 : index
    %28 = vector.load %arg9[%c0_15, %c0_16] : memref<16x1xf32, #tpu.memory_space<vmem>>, vector<16x1xf32>
    %29 = arith.mulf %23, %28 : vector<16x1xf32>
    %cst_17 = arith.constant dense<0.000000e+00> : vector<16xf32>
    %30 = vector.multi_reduction <add>, %26, %cst_17 [1] : vector<16x8xf32> to vector<16xf32>
    %31 = vector.shape_cast %30 : vector<16xf32> to vector<16x1xf32>
    %32 = arith.addf %29, %31 : vector<16x1xf32>
    %c0_18 = arith.constant 0 : index
    %c0_19 = arith.constant 0 : index
    %33 = vector.load %arg9[%c0_18, %c0_19] : memref<16x1xf32, #tpu.memory_space<vmem>>, vector<16x1xf32>
    tpu.vector_store %arg9[%c0_18, %c0_19], %32 {strides = array<i32>} : memref<16x1xf32, #tpu.memory_space<vmem>>, vector<16x1xf32>,
    %c0_20 = arith.constant 0 : index
    %c0_21 = arith.constant 0 : index
    %34 = vector.load %arg10[%c0_20, %c0_21] : memref<16x1xf32, #tpu.memory_space<vmem>>, vector<16x1xf32>
    %35 = arith.mulf %23, %34 : vector<16x1xf32>
    %cst_22 = arith.constant dense<0.000000e+00> : vector<16xf32>
    %36 = vector.multi_reduction <add>, %27, %cst_22 [1] : vector<16x8xf32> to vector<16xf32>
    %37 = vector.shape_cast %36 : vector<16xf32> to vector<16x1xf32>
    %38 = arith.addf %35, %37 : vector<16x1xf32>
    %c0_23 = arith.constant 0 : index
    %c0_24 = arith.constant 0 : index
    %39 = vector.load %arg10[%c0_23, %c0_24] : memref<16x1xf32, #tpu.memory_space<vmem>>, vector<16x1xf32>
    tpu.vector_store %arg10[%c0_23, %c0_24], %38 {strides = array<i32>} : memref<16x1xf32, #tpu.memory_space<vmem>>, vector<16x1xf32>,
    %c0_25 = arith.constant 0 : index
    %c0_26 = arith.constant 0 : index
    %40 = vector.load %arg11[%c0_25, %c0_26] : memref<16x1xf32, #tpu.memory_space<vmem>>, vector<16x1xf32>
    %41 = arith.mulf %23, %40 : vector<16x1xf32>
    %42 = arith.mulf %27, %4 : vector<16x8xf32>
    %cst_27 = arith.constant dense<0.000000e+00> : vector<16xf32>
    %43 = vector.multi_reduction <add>, %42, %cst_27 [1] : vector<16x8xf32> to vector<16xf32>
    %44 = vector.shape_cast %43 : vector<16xf32> to vector<16x1xf32>
    %45 = arith.addf %41, %44 : vector<16x1xf32>
    %c0_28 = arith.constant 0 : index
    %c0_29 = arith.constant 0 : index
    %46 = vector.load %arg11[%c0_28, %c0_29] : memref<16x1xf32, #tpu.memory_space<vmem>>, vector<16x1xf32>
    tpu.vector_store %arg11[%c0_28, %c0_29], %45 {strides = array<i32>} : memref<16x1xf32, #tpu.memory_space<vmem>>, vector<16x1xf32>,
    %c0_30 = arith.constant 0 : index
    %c0_31 = arith.constant 0 : index
    %47 = vector.load %arg8[%c0_30, %c0_31] : memref<16x1xf32, #tpu.memory_space<vmem>>, vector<16x1xf32>
    tpu.vector_store %arg8[%c0_30, %c0_31], %21 {strides = array<i32>} : memref<16x1xf32, #tpu.memory_space<vmem>>, vector<16x1xf32>,
    %c0_i32_32 = arith.constant 0 : i32
    %48 = arith.cmpi eq, %arg1, %c0_i32_32 : i32
    %49 = arith.extui %48 : i1 to i32
    %c0_i32_33 = arith.constant 0 : i32
    %50 = arith.cmpi ne, %49, %c0_i32_33 : i32
    scf.if %50 {
      %c0_34 = arith.constant 0 : index
      %c0_35 = arith.constant 0 : index
      %51 = vector.load %arg9[%c0_34, %c0_35] : memref<16x1xf32, #tpu.memory_space<vmem>>, vector<16x1xf32>
      %52 = tpu.reciprocal %51 : vector<16x1xf32> -> vector<16x1xf32>
      %c0_36 = arith.constant 0 : index
      %c0_37 = arith.constant 0 : index
      %53 = vector.load %arg10[%c0_36, %c0_37] : memref<16x1xf32, #tpu.memory_space<vmem>>, vector<16x1xf32>
      %54 = arith.mulf %53, %52 : vector<16x1xf32>
      %c0_38 = arith.constant 0 : index
      %c0_39 = arith.constant 0 : index
      %55 = vector.load %arg11[%c0_38, %c0_39] : memref<16x1xf32, #tpu.memory_space<vmem>>, vector<16x1xf32>
      %56 = arith.mulf %55, %52 : vector<16x1xf32>
      %57 = arith.mulf %54, %54 : vector<16x1xf32>
      %58 = arith.subf %56, %57 : vector<16x1xf32>
      %cst_40 = arith.constant 9.99999971E-10 : f32
      %59 = vector.broadcast %cst_40 : f32 to vector<16x1xf32>
      %60 = arith.maximumf %58, %59 : vector<16x1xf32>
      %61 = math.sqrt %60 : vector<16x1xf32>
      %c0_41 = arith.constant 0 : index
      %c0_42 = arith.constant 0 : index
      %c0_43 = arith.constant 0 : index
      %62 = vector.load %arg7[%c0_41, %c0_42, %c0_43] : memref<1x16x2xf32, #tpu.memory_space<vmem>>, vector<1x16x1xf32>
      %63 = vector.shape_cast %62 : vector<1x16x1xf32> to vector<16x1xf32>
      %64 = vector.shape_cast %54 : vector<16x1xf32> to vector<1x16x1xf32>
      tpu.vector_store %arg7[%c0_41, %c0_42, %c0_43], %64 {strides = array<i32>} : memref<1x16x2xf32, #tpu.memory_space<vmem>>, vector<1x16x1xf32>,
      %c0_44 = arith.constant 0 : index
      %c0_45 = arith.constant 0 : index
      %c1 = arith.constant 1 : index
      %65 = vector.load %arg7[%c0_44, %c0_45, %c1] : memref<1x16x2xf32, #tpu.memory_space<vmem>>, vector<1x16x1xf32>
      %66 = vector.shape_cast %65 : vector<1x16x1xf32> to vector<16x1xf32>
      %67 = vector.shape_cast %61 : vector<16x1xf32> to vector<1x16x1xf32>
      tpu.vector_store %arg7[%c0_44, %c0_45, %c1], %67 {strides = array<i32>} : memref<1x16x2xf32, #tpu.memory_space<vmem>>, vector<1x16x1xf32>,
    } else {
    }
    return
  }
  func.func @transform_0(%arg0: i32, %arg1: i32) -> (i32, i32, i32) {
    %c0_i32 = arith.constant 0 : i32
    %c0_i32_0 = arith.constant 0 : i32
    return %arg0, %c0_i32, %arg1 : i32, i32, i32
  }
  func.func @transform_1(%arg0: i32, %arg1: i32) -> (i32, i32) {
    %c0_i32 = arith.constant 0 : i32
    %c0_i32_0 = arith.constant 0 : i32
    %c0_i32_1 = arith.constant 0 : i32
    return %c0_i32, %c0_i32_0 : i32, i32
  }
  func.func @transform_2(%arg0: i32, %arg1: i32) -> (i32, i32) {
    %c0_i32 = arith.constant 0 : i32
    %c0_i32_0 = arith.constant 0 : i32
    %c0_i32_1 = arith.constant 0 : i32
    return %c0_i32, %c0_i32_0 : i32, i32
  }
  func.func @transform_3(%arg0: i32, %arg1: i32) -> (i32, i32) {
    %c0_i32 = arith.constant 0 : i32
    %c0_i32_0 = arith.constant 0 : i32
    %c0_i32_1 = arith.constant 0 : i32
    return %c0_i32, %c0_i32_0 : i32, i32
  }
  func.func @transform_4(%arg0: i32, %arg1: i32) -> (i32, i32) {
    %c0_i32 = arith.constant 0 : i32
    %c0_i32_0 = arith.constant 0 : i32
    %c0_i32_1 = arith.constant 0 : i32
    return %c0_i32, %c0_i32_0 : i32, i32
  }
  func.func @transform_5(%arg0: i32, %arg1: i32) -> (i32, i32, i32) {
    %c0_i32 = arith.constant 0 : i32
    %c0_i32_0 = arith.constant 0 : i32
    %c0_i32_1 = arith.constant 0 : i32
    return %arg0, %c0_i32, %c0_i32_0 : i32, i32, i32
  }
}

</mosaic_0001>

<bundles_post_ra>
// kernel: tpu_custom_call.1
= control target key start
LH: loop header
LB: loop body
LE: loop exit
PB: predicated region body
PF: predicated region fallthrough
CT: control target
= control target key end

     0   :  { %s693_s18 = smov 0   ;;  %s695_s19 = smov 0   ;;  %s791_s0 = inlined_call_operand.vmem [shape: f32[2,16,8], index: 0, kind: input, shape index: {}]   ;;  %s792_s1 = inlined_call_operand.vmem [shape: bf16[8,16], index: 1, kind: input, shape index: {}]   ;;  %s793_s2 = inlined_call_operand.vmem [shape: f32[8,1], index: 2, kind: input, shape index: {}]   ;;  %s794_s3 = inlined_call_operand.vmem [shape: bf16[16,8], index: 3, kind: input, shape index: {}]   ;;  %s795_s4 = inlined_call_operand.vmem [shape: f32[16,1], index: 4, kind: input, shape index: {}]   ;;  %s796_s5 = inlined_call_operand.vmem [shape: f32[2,16,2], index: 5, kind: output, shape index: {}]  }
   0x1   :  { %s697_s20 = smov 0  }
   0x2 LB: > { %s27_s21 = sadd.s32 1, %s653_s19  ;;  %p570_p0 = scmp.ge.s32.totalorder %s657_s20, 1  ;;  %s657_s20 = sphi %s697_s20, %s15_s20   ;;  %s653_s19 = sphi %s695_s19, %s798_s19   ;;  %s649_s18 = sphi %s693_s18, %s797_s18  }
   0x3   : > { %p29_p1 = scmp.ge.s32.totalorder %s27_s21, 2  ;;  %p204_p2 = scmp.lt.s32.totalorder %s657_s20, 3 }
   0x5   : > { %s800_s21 = smov (%p29_p1, %s27_s21), 0  ;;  %p205_p3 = pnand %p570_p0, %p204_p2 }
   0x6   : > { %p235_p4 = scmp.lt.s32.totalorder (!%p205_p3), %s649_s18, 1  ;;  %s662_s14 = smov (!%p205_p3), 1  }
   0x7   : > { %208 = sbr.rel (%p205_p3) target bundleno = 832 (0x340), region = 40 }
   0xc   : > { %v266_v0 = vld [vmem:[%s793_s2] sm:$0xff]  ;;  %v659_v1 = vmov 0   ;;  %s802_s18 = smov (!%p235_p4, %s649_s18), 1  ;;  %vm272_vm0 = vcmask 130048   ;;  %v294_v7 = vld [vmem:[%s795_s4 + $0x8] sm:$0xff]  ;;  %vm314_vm1 = vcmask 1043456  }
   0xd   : > { %614 = vset.pattern.permute.xlu0 %v659_v1  ;;  %615 = vset.pattern.permute.xlu1 %v659_v1  ;;  %s583_s24 = sshll.u32 %s802_s18, 4  ;;  %v293_v5 = vld [vmem:[%s795_s4] sm:$0xff]  ;;  %vm310_vm2 = vcmask 64512   ;;  %vm253_vm3 = vcmask 7168   ;;  %v660_v16 = vmov -inf   ;;  %v661_v25 = vmov 0.0  }
   0xe   : > { %269 = vperm.xlu0 %614, %v266_v0   ;;  %616 = vset.pattern.permute.xlu2 %v659_v1  ;;  %s242_s27 = scalar_lea.vmem %s791_s0, %s583_s24  ;;  %v265_v6 = vld [vmem:[%s792_s1] sm:$0xf]  ;;  %254 = vst.msk [vmem:[#allocation2] sm:$0xff] %vm253_vm3, %v660_v16  ;;  %s771_s13 = scalar_lea.vmem %s796_s5, %s583_s24 }
   0xf   : > { %v722_v2 = vld [vmem:[%s242_s27] sm:$0xff]  ;;  %v724_v3 = vld [vmem:[%s242_s27 + $0x8] sm:$0xff]  ;;  %302 = vperm.xlu1 %615, %v294_v7   ;;  %255 = vst.msk [vmem:[#allocation2 + $0x8] sm:$0xff] %vm253_vm3, %v660_v16 }
  0x10   : > { %v264_v4 = vpack.c.bf16 %v724_v3, %v722_v2  ;;  %v585_v15 = vld [vmem:[%s794_s3] sm:$0xff]  ;;  %256 = vst.msk [vmem:[#allocation3] sm:$0xff] %vm253_vm3, %v661_v25 }
  0x11   : > { %257 = vst.msk [vmem:[#allocation3 + $0x8] sm:$0xff] %vm253_vm3, %v661_v25 }
  0x12   : > { %283 = vmatpush.bf16.msra.mxu0 %v264_v4  ;;  %258 = vst.msk [vmem:[#allocation4] sm:$0xff] %vm253_vm3, %v661_v25 }
  0x13   : > { %259 = vst.msk [vmem:[#allocation4 + $0x8] sm:$0xff] %vm253_vm3, %v661_v25 }
  0x14   : > { %260 = vst.msk [vmem:[#allocation5] sm:$0xff] %vm253_vm3, %v661_v25 }
  0x15   : > { %575 = vmatmul.msk.bf16.vlgmr.msra.gmra.mxu0 %vm272_vm0, %v265_v6  ;;  %261 = vst.msk [vmem:[#allocation5 + $0x8] sm:$0xff] %vm253_vm3, %v661_v25  ;;  %v332_v26 = vld [vmem:[#allocation2] sm:$0xff]  ;;  %vm494_vm0 = vcmask 15368  }
  0x16   : > { %297 = vperm.xlu0 %614, %v293_v5   ;;  %v333_v30 = vld [vmem:[#allocation2 + $0x8] sm:$0xff] }
  0x17   : > { %v366_v54 = vld [vmem:[#allocation3] sm:$0xff] }
  0x18   : > { %v367_v16 = vld [vmem:[#allocation3 + $0x8] sm:$0xff] }
  0x19   : > { %v381_v55 = vld [vmem:[#allocation4] sm:$0xff] }
  0x1b   : > { %v395_v62 = vld [vmem:[#allocation5] sm:$0xff] }
  0x80   : > { %v270_v8 = vpop.permute.xlu0 %269 }
  0x81   : > { %v303_v21 = vpop.permute.xlu1 %302 }
  0x88   : > { %v298_v17 = vpop.permute.xlu0 %297 }
  0x92   : > { %v285_v9 = vpop.f32.mrf.mxu0 }
  0x93   : > { %v286_v10 = vadd.f32 %v285_v9, %v270_v8 }
  0x95   : > { %617 = vtanh.f32 %v286_v10 }
  0x9a   : > { %v287_v11 = vpop.f32.mrf.mxu0 }
  0x9b   : > { %v618_v12 = vpop.eup %617 }
  0x9c   : > { %v292_v13 = vpack.c.bf16 %v618_v12, %v618_v12 }
  0x9e   : > { %v316_v14 = vsel %vm314_vm1, %v292_v13, 0 }
  0x9f   : > { %325 = vmatpush.bf16.msra.mxu1 %v316_v14 }
  0xa2   : > { %580 = vmatmul.msk.bf16.vlgmr.msra.gmra.mxu1 %vm310_vm2, %v585_v15 }
 0x11f   : > { %v327_v18 = vpop.f32.mrf.mxu1 }
 0x120   : > { %v328_v19 = vadd.f32 %v327_v18, %v298_v17 }
 0x122   : > { %v334_v20 = vsel %vm310_vm2, %v328_v19, -inf }
 0x123   : > { %335 = vmax.xlane.f32.xlu1 %v334_v20 }
 0x127   : > { %v329_v22 = vpop.f32.mrf.mxu1 }
 0x128   : > { %v330_v23 = vadd.f32 %v329_v22, %v303_v21 }
 0x12a   : > { %v337_v24 = vsel %vm310_vm2, %v330_v23, -inf }
 0x12b   : > { %338 = vmax.xlane.f32.xlu2 %v337_v24 }
 0x196   : > { %v336_v27 = vpop.xlane.xlu1 %335 }
 0x197   : > { %v340_v28 = vmax.f32 %v332_v26, %v336_v27 }
 0x199   : > { %v342_v29 = vsub.f32 %v332_v26, %v340_v28  ;;  %411 = vst.msk [vmem:[#allocation2] sm:$0xff] %vm253_vm3, %v340_v28  ;;  %350 = vperm.xlu2 %616, %v340_v28  }
 0x19b   : > { %v344_v52 = vmul.f32 1.442695, %v342_v29 }
 0x19e   : > { %v339_v31 = vpop.xlane.xlu2 %338 }
 0x19f   : > { %v341_v32 = vmax.f32 %v333_v30, %v339_v31 }
 0x1a1   : > { %v343_v33 = vsub.f32 %v333_v30, %v341_v32  ;;  %412 = vst.msk [vmem:[#allocation2 + $0x8] sm:$0xff] %vm253_vm3, %v341_v32  ;;  %355 = vperm.xlu0 %614, %v341_v32   ;;  %v396_v30 = vld [vmem:[#allocation5 + $0x8] sm:$0xff] }
 0x1a3   : > { %v346_v4 = vmul.f32 1.442695, %v343_v33 }
 0x1f3   : > { %v351_v34 = vpop.permute.xlu2 %350 }
 0x1f4   : > { %v358_v35 = vsub.f32 %v328_v19, %v351_v34  ;;  %v382_v19 = vld [vmem:[#allocation4 + $0x8] sm:$0xff] }
 0x1f6   : > { %v360_v36 = vmul.f32 1.442695, %v358_v35 }
 0x1f8   : > { %619 = vpow2.f32 %v360_v36 }
 0x1fe   : > { %v620_v37 = vpop.eup %619 }
 0x1ff   : > { %v370_v38 = vsel %vm310_vm2, %v620_v37, 0.0  ;;  %v364_v39 = vmul.f32 %v620_v37, %v722_v2 }
 0x200   : > { %371 = vadd.xlane.f32.xlu0 %v370_v38 }
 0x201   : > { %v385_v40 = vsel %vm310_vm2, %v364_v39, 0.0  ;;  %v399_v41 = vmul.f32 %v364_v39, %v722_v2 }
 0x202   : > { %386 = vadd.xlane.f32.xlu1 %v385_v40 }
 0x203   : > { %v401_v42 = vsel %vm310_vm2, %v399_v41, 0.0 }
 0x208   : > { %402 = vadd.xlane.f32.xlu0 %v401_v42 }
 0x213   : > { %v356_v43 = vpop.permute.xlu0 %355 }
 0x214   : > { %v359_v44 = vsub.f32 %v330_v23, %v356_v43 }
 0x216   : > { %v362_v45 = vmul.f32 1.442695, %v359_v44 }
 0x218   : > { %621 = vpow2.f32 %v362_v45 }
 0x219   : > { %623 = vpow2.f32 %v344_v52 }
 0x21e   : > { %v622_v46 = vpop.eup %621 }
 0x21f   : > { %v373_v47 = vsel %vm310_vm2, %v622_v46, 0.0  ;;  %v365_v48 = vmul.f32 %v622_v46, %v724_v3  ;;  %v624_v53 = vpop.eup %623 }
 0x220   : > { %374 = vadd.xlane.f32.xlu2 %v373_v47  ;;  %v368_v56 = vmul.f32 %v624_v53, %v366_v54  ;;  %v383_v59 = vmul.f32 %v624_v53, %v381_v55  ;;  %v397_v63 = vmul.f32 %v624_v53, %v395_v62 }
 0x221   : > { %v388_v49 = vsel %vm310_vm2, %v365_v48, 0.0  ;;  %v400_v50 = vmul.f32 %v365_v48, %v724_v3 }
 0x222   : > { %389 = vadd.xlane.f32.xlu1 %v388_v49 }
 0x223   : > { %v404_v51 = vsel %vm310_vm2, %v400_v50, 0.0 }
 0x22a   : > { %405 = vadd.xlane.f32.xlu1 %v404_v51 }
 0x273   : > { %v372_v57 = vpop.xlane.xlu0 %371 }
 0x274   : > { %v376_v58 = vadd.f32 %v372_v57, %v368_v56 }
 0x275   : > { %v387_v60 = vpop.xlane.xlu1 %386 }
 0x276   : > { %379 = vst.msk [vmem:[#allocation3] sm:$0xff] %vm253_vm3, %v376_v58  ;;  %v391_v61 = vadd.f32 %v387_v60, %v383_v59 }
 0x278   : > { %393 = vst.msk [vmem:[#allocation4] sm:$0xff] %vm253_vm3, %v391_v61 }
 0x27b   : > { %v403_v0 = vpop.xlane.xlu0 %402 }
 0x27c   : > { %v407_v1 = vadd.f32 %v403_v0, %v397_v63 }
 0x27d   : > { %v416_v2 = vld [vmem:[#allocation3] sm:$0xff] }
 0x27e   : > { %625 = vrcp.f32 %v416_v2  ;;  %409 = vst.msk [vmem:[#allocation5] sm:$0xff] %vm253_vm3, %v407_v1  ;;  %v429_v7 = vand.u32 2147483648, %v416_v2  ;;  %v427_v9 = vand.u32 2147483647, %v416_v2  ;;  %vm423_vm5 = vweird.f32 %v416_v2 }
 0x27f   : > { %627 = vpow2.f32 %v346_v4  ;;  %v446_v14 = vld [vmem:[#allocation4] sm:$0xff] }
 0x280   : > { %v430_v11 = vor.u32 1.1754944e-38, %v429_v7  ;;  %vm428_vm7 = vcmp.eq.f32.partialorder %v427_v9, 8.507059e+37 }
 0x284   : > { %v626_v3 = vpop.eup %625 }
 0x285   : > { %v419_v5 = vmul.f32 %v626_v3, %v416_v2  ;;  %vm424_vm4 = vweird.f32 %v626_v3  ;;  %v628_v15 = vpop.eup %627  ;;  %v450_v18 = vld [vmem:[#allocation5] sm:$0xff] }
 0x286   : > { %vm425_vm6 = vmor %vm423_vm5, %vm424_vm4  ;;  %v369_v22 = vmul.f32 %v628_v15, %v367_v16  ;;  %v384_v26 = vmul.f32 %v628_v15, %v382_v19  ;;  %v398_v31 = vmul.f32 %v628_v15, %v396_v30 }
 0x287   : > { %v420_v6 = vsub.f32 1.0, %v419_v5 }
 0x289   : > { %v421_v8 = vmul.f32 %v626_v3, %v420_v6 }
 0x28b   : > { %v422_v10 = vadd.f32 %v626_v3, %v421_v8 }
 0x28d   : > { %v426_v12 = vsel %vm425_vm6, %v626_v3, %v422_v10 }
 0x28e   : > { %v431_v13 = vsel %vm428_vm7, %v430_v11, %v426_v12 }
 0x28f   : > { %v448_v17 = vmul.f32 %v446_v14, %v431_v13  ;;  %v452_v20 = vmul.f32 %v450_v18, %v431_v13 }
 0x291   : > { %v454_v21 = vmul.f32 %v448_v17, %v448_v17  ;;  %484 = vst.msk [vmem:[%s771_s13] sm:$0xff] %vm253_vm3, %v448_v17 }
 0x293   : > { %v375_v23 = vpop.xlane.xlu2 %374  ;;  %v456_v24 = vsub.f32 %v452_v20, %v454_v21 }
 0x294   : > { %v377_v25 = vadd.f32 %v375_v23, %v369_v22 }
 0x295   : > { %v390_v27 = vpop.xlane.xlu1 %389  ;;  %v458_v28 = vmax.f32 %v456_v24, 1e-09 }
 0x296   : > { %380 = vst.msk [vmem:[#allocation3 + $0x8] sm:$0xff] %vm253_vm3, %v377_v25  ;;  %v392_v29 = vadd.f32 %v390_v27, %v384_v26 }
 0x297   : > { %629 = vrsqrt.f32 %v458_v28  ;;  %vm467_vm8 = vcmp.eq.f32.partialorder %v458_v28, inf  ;;  %v470_v46 = vand.u32 2147483648, %v458_v28  ;;  %vm469_vm10 = vcmp.eq.f32.partialorder %v458_v28, 0.0 }
 0x298   : > { %394 = vst.msk [vmem:[#allocation4 + $0x8] sm:$0xff] %vm253_vm3, %v392_v29 }
 0x29d   : > { %v630_v32 = vpop.eup %629  ;;  %v417_v33 = vld [vmem:[#allocation3 + $0x8] sm:$0xff]  ;;  %v406_v34 = vpop.xlane.xlu1 %405 }
 0x29e   : > { %631 = vrcp.f32 %v417_v33  ;;  %v408_v35 = vadd.f32 %v406_v34, %v398_v31  ;;  %v461_v36 = vmul.f32 %v630_v32, %v458_v28  ;;  %v443_v45 = vand.u32 2147483648, %v417_v33 }
 0x29f   : > { %v441_v48 = vand.u32 2147483647, %v417_v33  ;;  %vm437_vm11 = vweird.f32 %v417_v33  ;;  %v447_v55 = vld [vmem:[#allocation4 + $0x8] sm:$0xff] }
 0x2a0   : > { %410 = vst.msk [vmem:[#allocation5 + $0x8] sm:$0xff] %vm253_vm3, %v408_v35  ;;  %v462_v37 = vmul.f32 %v630_v32, %v461_v36  ;;  %v444_v52 = vor.u32 1.1754944e-38, %v443_v45 }
 0x2a1   : > { %vm442_vm13 = vcmp.eq.f32.partialorder %v441_v48, 8.507059e+37 }
 0x2a2   : > { %v463_v38 = vmul.f32 0.5, %v462_v37 }
 0x2a4   : > { %v632_v39 = vpop.eup %631  ;;  %v464_v40 = vsub.f32 1.5, %v463_v38 }
 0x2a5   : > { %v433_v41 = vmul.f32 %v632_v39, %v417_v33  ;;  %vm438_vm9 = vweird.f32 %v632_v39 }
 0x2a6   : > { %v465_v42 = vmul.f32 %v630_v32, %v464_v40  ;;  %vm439_vm12 = vmor %vm437_vm11, %vm438_vm9 }
 0x2a7   : > { %v434_v43 = vsub.f32 1.0, %v433_v41  ;;  %v451_v57 = vld [vmem:[#allocation5 + $0x8] sm:$0xff] }
 0x2a8   : > { %v466_v44 = vmul.f32 %v465_v42, %v458_v28 }
 0x2a9   : > { %v435_v47 = vmul.f32 %v632_v39, %v434_v43 }
 0x2aa   : > { %v468_v49 = vsel %vm467_vm8, %v458_v28, %v466_v44 }
 0x2ab   : > { %v471_v50 = vsel %vm469_vm10, %v470_v46, %v468_v49  ;;  %v436_v51 = vadd.f32 %v632_v39, %v435_v47 }
 0x2ac   : > { %488 = vrot.lane.b32.xlu2 %v471_v50, %s662_s14 }
 0x2ad   : > { %v440_v53 = vsel %vm439_vm12, %v632_v39, %v436_v51 }
 0x2ae   : > { %v445_v54 = vsel %vm442_vm13, %v444_v52, %v440_v53 }
 0x2af   : > { %v449_v56 = vmul.f32 %v447_v55, %v445_v54  ;;  %v453_v58 = vmul.f32 %v451_v57, %v445_v54 }
 0x2b1   : > { %v455_v59 = vmul.f32 %v449_v56, %v449_v56  ;;  %485 = vst.msk [vmem:[%s771_s13 + $0x8] sm:$0xff] %vm253_vm3, %v449_v56 }
 0x2b3   : > { %v457_v60 = vsub.f32 %v453_v58, %v455_v59 }
 0x2b5   : > { %v459_v61 = vmax.f32 %v457_v60, 1e-09 }
 0x2b7   : > { %633 = vrsqrt.f32 %v459_v61  ;;  %vm479_vm14 = vcmp.eq.f32.partialorder %v459_v61, inf  ;;  %v482_v5 = vand.u32 2147483648, %v459_v61  ;;  %vm481_vm15 = vcmp.eq.f32.partialorder %v459_v61, 0.0 }
 0x2bd   : > { %v634_v62 = vpop.eup %633 }
 0x2be   : > { %v473_v63 = vmul.f32 %v634_v62, %v459_v61 }
 0x2c0   : > { %v474_v0 = vmul.f32 %v634_v62, %v473_v63 }
 0x2c2   : > { %v475_v1 = vmul.f32 0.5, %v474_v0 }
 0x2c4   : > { %v476_v2 = vsub.f32 1.5, %v475_v1 }
 0x2c6   : > { %v477_v3 = vmul.f32 %v634_v62, %v476_v2 }
 0x2c8   : > { %v478_v4 = vmul.f32 %v477_v3, %v459_v61 }
 0x2ca   : > { %v480_v6 = vsel %vm479_vm14, %v459_v61, %v478_v4 }
 0x2cb   : > { %v483_v7 = vsel %vm481_vm15, %v482_v5, %v480_v6 }
 0x2cc   : > { %490 = vrot.lane.b32.xlu0 %v483_v7, %s662_s14 }
 0x306   : > { %v489_v8 = vpop.permute.xlu2 %488 }
 0x307   : > { %495 = vst.msk [vmem:[%s771_s13] sm:$0xff] %vm494_vm0, %v489_v8 }
 0x33e   : > { %v491_v9 = vpop.permute.xlu0 %490 }
 0x33f   : > { %496 = vst.msk [vmem:[%s771_s13 + $0x8] sm:$0xff] %vm494_vm0, %v491_v9 }
 0x340 PF: > { %s15_s20 = sadd.s32 1, %s657_s20   ;;  %s797_s18 = smov %s653_s19 }
 0x341   : > { %p12_p5 = scmp.ge.s32.totalorder %s15_s20, 4   ;;  %s798_s19 = smov %s800_s21 }
 0x343   :  { %14 = sbr.rel (!%p12_p5) target bundleno = 2 (0x2), region = 78 }

</bundles_post_ra>
